<compile_context>
chip_gen: v7x
topology: tpu7x:2x2x1
jax: 0.10.0
libtpu: 0.0.40
codegen_flags: <defaults>
</compile_context>

<pallas_src>
import math

import jax
import jax.numpy as jnp
from jax.experimental import pallas as pl
from jax.experimental.pallas import tpu as pltpu


# ----------------------------------------------------------------------------
# Pallas kernel: one image (all H*W pixels) per grid step; weights resident.
# ----------------------------------------------------------------------------
def _channel_attention_kernel(x_ref, w1_ref, b1_ref, w2_ref, b2_ref, out_ref):
    # x_ref: (1, P, C) -- one image's pixels, channels on the lane axis.
    x = x_ref[0].astype(jnp.float32)                        # (P, C)

    # AdaptiveAvgPool2d(1) / AdaptiveMaxPool2d(1): reduce over the pixel axis.
    avg = jnp.mean(x, axis=0, keepdims=True)                # (1, C)
    mx = jnp.max(x, axis=0, keepdims=True)                  # (1, C)

    # Both branches share the same fc -> stack into one M=2 GEMM per layer.
    pooled = jnp.concatenate([avg, mx], axis=0)             # (2, C)

    # fc layer 1: Conv1x1(no bias) + BN (folded) + ReLU
    h = jnp.maximum(
        jnp.dot(pooled, w1_ref[...], preferred_element_type=jnp.float32)
        + b1_ref[...], 0.0)                                 # (2, C//r)

    # fc layer 2: Conv1x1(no bias) + BN (folded)
    y = (jnp.dot(h, w2_ref[...], preferred_element_type=jnp.float32)
         + b2_ref[...])                                     # (2, C)

    # sigmoid(avg_out + max_out)
    out = jax.nn.sigmoid(y[0:1, :] + y[1:2, :])             # (1, C)
    out_ref[0] = out.astype(out_ref.dtype)


# ----------------------------------------------------------------------------
# Wrapper: grid over batch, full-image pixel blocks, resident folded weights.
# ----------------------------------------------------------------------------
def channel_attention(x_nhwc, p):
    N, H, W, C = x_nhwc.shape
    P = H * W
    x_flat = x_nhwc.reshape(N, P, C)        # wrapper-side reshape: free metadata

    def full_spec(shape):
        nd = len(shape)
        return pl.BlockSpec(shape, lambda n, _nd=nd: (0,) * _nd)

    out = pl.pallas_call(
        _channel_attention_kernel,
        out_shape=jax.ShapeDtypeStruct((N, 1, C), jnp.float32),
        grid_spec=pltpu.PrefetchScalarGridSpec(
            num_scalar_prefetch=0,
            grid=(N,),
            in_specs=[
                pl.BlockSpec((1, P, C), lambda n: (n, 0, 0)),
                full_spec(p["w1"].shape), full_spec(p["b1"].shape),
                full_spec(p["w2"].shape), full_spec(p["b2"].shape),
            ],
            out_specs=pl.BlockSpec((1, 1, C), lambda n: (n, 0, 0))),
        compiler_params=pltpu.CompilerParams(
            dimension_semantics=("parallel",)),
    )(x_flat, p["w1"], p["b1"], p["w2"], p["b2"])

    return out[:, 0, :]                      # (N, C) == torch (N, C, 1, 1)


# ----------------------------------------------------------------------------
# Deterministic parameters: Conv(bias=False) + BN folded to affine (inference).
# ----------------------------------------------------------------------------
def make_params(key, C, r, eps=1e-5):
    Cr = C // r
    keys = iter(jax.random.split(key, 16))

    def conv_w(cin, cout):
        return jax.random.normal(next(keys), (cin, cout), jnp.float32) / math.sqrt(cin)

    def bn(c):
        g = 1.0 + 0.1 * jax.random.normal(next(keys), (c,), jnp.float32)
        b = 0.05 * jax.random.normal(next(keys), (c,), jnp.float32)
        m = 0.02 * jax.random.normal(next(keys), (c,), jnp.float32)
        v = jax.random.uniform(next(keys), (c,), jnp.float32, minval=0.5, maxval=1.5)
        return g, b, m, v

    def fold(w, bnp):
        g, be, m, v = bnp
        s = g / jnp.sqrt(v + eps)
        # Conv has no bias: y = (x @ w) * s + (be - m * s)
        return w * s[None, :], ((-m) * s + be)[None, :]

    w1, b1 = fold(conv_w(C, Cr), bn(Cr))
    w2, b2 = fold(conv_w(Cr, C), bn(C))
    return dict(w1=w1, b1=b1, w2=w2, b2=b2)


# ----------------------------------------------------------------------------
# Pure-JAX reference (same folded parameters) for correctness check.
# ----------------------------------------------------------------------------
def reference(x_nhwc, p):
    avg = jnp.mean(x_nhwc, axis=(1, 2))      # (N, C)
    mx = jnp.max(x_nhwc, axis=(1, 2))        # (N, C)

    def fc(v):
        h = jax.nn.relu(v @ p["w1"] + p["b1"])
        return h @ p["w2"] + p["b2"]

    return jax.nn.sigmoid(fc(avg) + fc(mx))


if __name__ == "__main__":
    # Module config: in_channels=64, reduction=4; small batch/spatial.
    N, H, W = 2, 16, 16
    C, r = 64, 4

    key = jax.random.PRNGKey(0)
    kx, kp = jax.random.split(key)
    x = jax.random.normal(kx, (N, H, W, C), jnp.float32)   # NHWC
    params = make_params(kp, C, r)

    out = channel_attention(x, params)
    out = jax.block_until_ready(out)

    ref = reference(x, params)
    assert out.shape == (N, C), out.shape
    max_err = float(jnp.max(jnp.abs(out - ref)))
    assert max_err < 1e-4, f"mismatch vs reference: max abs err = {max_err}"

    print("KERNEL_OK")
</pallas_src>

<mosaic_0001>
module attributes {stable_mosaic.version = 11 : i64} {
  func.func @_channel_attention_kernel(%arg0: i32, %arg1: memref<1x256x64xf32, #tpu.memory_space<vmem>>, %arg2: memref<64x16xf32, #tpu.memory_space<vmem>>, %arg3: memref<1x16xf32, #tpu.memory_space<vmem>>, %arg4: memref<16x64xf32, #tpu.memory_space<vmem>>, %arg5: memref<1x64xf32, #tpu.memory_space<vmem>>, %arg6: memref<1x1x64xf32, #tpu.memory_space<vmem>>) attributes {dimension_semantics = [#tpu.dimension_semantics<parallel>], iteration_bounds = array<i64: 2>, scalar_prefetch = 0 : i64, scratch_operands = 0 : i64, tpu.core_type = #tpu.core_type<tc>, window_params = [{transform_indices = @transform_0, window_bounds = array<i64: 1, 256, 64>}, {pipeline_mode = #tpu.pipeline_mode<synchronous>, transform_indices = @transform_1, window_bounds = array<i64: 64, 16>}, {pipeline_mode = #tpu.pipeline_mode<synchronous>, transform_indices = @transform_2, window_bounds = array<i64: 1, 16>}, {pipeline_mode = #tpu.pipeline_mode<synchronous>, transform_indices = @transform_3, window_bounds = array<i64: 16, 64>}, {pipeline_mode = #tpu.pipeline_mode<synchronous>, transform_indices = @transform_4, window_bounds = array<i64: 1, 64>}, {transform_indices = @transform_5, window_bounds = array<i64: 1, 1, 64>}]} {
    %c0 = arith.constant 0 : index
    %c0_0 = arith.constant 0 : index
    %c0_1 = arith.constant 0 : index
    %0 = vector.load %arg1[%c0, %c0_0, %c0_1] : memref<1x256x64xf32, #tpu.memory_space<vmem>>, vector<1x256x64xf32>
    %1 = vector.shape_cast %0 : vector<1x256x64xf32> to vector<256x64xf32>
    %cst = arith.constant dense<0.000000e+00> : vector<64xf32>
    %2 = vector.multi_reduction <add>, %1, %cst [0] : vector<256x64xf32> to vector<64xf32>
    %3 = vector.shape_cast %2 : vector<64xf32> to vector<1x64xf32>
    %cst_2 = arith.constant 2.560000e+02 : f32
    %4 = vector.broadcast %cst_2 : f32 to vector<1x64xf32>
    %5 = arith.divf %3, %4 : vector<1x64xf32>
    %cst_3 = arith.constant dense<0xFF800000> : vector<64xf32>
    %6 = vector.multi_reduction <maximumf>, %1, %cst_3 [0] : vector<256x64xf32> to vector<64xf32>
    %7 = vector.shape_cast %6 : vector<64xf32> to vector<1x64xf32>
    %8 = tpu.concatenate %5, %7 in 0 : vector<1x64xf32>, vector<1x64xf32> -> vector<2x64xf32>
    %c0_4 = arith.constant 0 : index
    %c0_5 = arith.constant 0 : index
    %9 = vector.load %arg2[%c0_4, %c0_5] : memref<64x16xf32, #tpu.memory_space<vmem>>, vector<64x16xf32>
    %cst_6 = arith.constant dense<0.000000e+00> : vector<2x16xf32>
    %10 = tpu.matmul %8, %9, %cst_6 {dimension_numbers = #tpu.dot_dimension_numbers<[1], [0], [0], [1], [0, 0, 1, 1], [], []>} : vector<2x64xf32>, vector<64x16xf32>, vector<2x16xf32> -> vector<2x16xf32>
    %c0_7 = arith.constant 0 : index
    %c0_8 = arith.constant 0 : index
    %11 = vector.load %arg3[%c0_7, %c0_8] : memref<1x16xf32, #tpu.memory_space<vmem>>, vector<1x16xf32>
    %12 = vector.broadcast %11 : vector<1x16xf32> to vector<2x16xf32>
    %13 = arith.addf %10, %12 : vector<2x16xf32>
    %cst_9 = arith.constant 0.000000e+00 : f32
    %14 = vector.broadcast %cst_9 : f32 to vector<2x16xf32>
    %15 = arith.maximumf %13, %14 : vector<2x16xf32>
    %c0_10 = arith.constant 0 : index
    %c0_11 = arith.constant 0 : index
    %16 = vector.load %arg4[%c0_10, %c0_11] : memref<16x64xf32, #tpu.memory_space<vmem>>, vector<16x64xf32>
    %cst_12 = arith.constant dense<0.000000e+00> : vector<2x64xf32>
    %17 = tpu.matmul %15, %16, %cst_12 {dimension_numbers = #tpu.dot_dimension_numbers<[1], [0], [0], [1], [0, 0, 1, 1], [], []>} : vector<2x16xf32>, vector<16x64xf32>, vector<2x64xf32> -> vector<2x64xf32>
    %c0_13 = arith.constant 0 : index
    %c0_14 = arith.constant 0 : index
    %18 = vector.load %arg5[%c0_13, %c0_14] : memref<1x64xf32, #tpu.memory_space<vmem>>, vector<1x64xf32>
    %19 = vector.broadcast %18 : vector<1x64xf32> to vector<2x64xf32>
    %20 = arith.addf %17, %19 : vector<2x64xf32>
    %21 = vector.extract_strided_slice %20 {offsets = [0, 0], sizes = [1, 64], strides = [1, 1]} : vector<2x64xf32> to vector<1x64xf32>
    %22 = vector.extract_strided_slice %20 {offsets = [1, 0], sizes = [1, 64], strides = [1, 1]} : vector<2x64xf32> to vector<1x64xf32>
    %23 = arith.addf %21, %22 : vector<1x64xf32>
    %24 = arith.negf %23 : vector<1x64xf32>
    %25 = math.exp %24 : vector<1x64xf32>
    %cst_15 = arith.constant 1.000000e+00 : f32
    %26 = vector.broadcast %cst_15 : f32 to vector<1x64xf32>
    %27 = arith.addf %26, %25 : vector<1x64xf32>
    %28 = arith.divf %26, %27 : vector<1x64xf32>
    %c0_16 = arith.constant 0 : index
    %c0_17 = arith.constant 0 : index
    %c0_18 = arith.constant 0 : index
    %29 = vector.load %arg6[%c0_16, %c0_17, %c0_18] : memref<1x1x64xf32, #tpu.memory_space<vmem>>, vector<1x1x64xf32>
    %30 = vector.shape_cast %29 : vector<1x1x64xf32> to vector<1x64xf32>
    %31 = vector.shape_cast %28 : vector<1x64xf32> to vector<1x1x64xf32>
    tpu.vector_store %arg6[%c0_16, %c0_17, %c0_18], %31 {strides = array<i32>} : memref<1x1x64xf32, #tpu.memory_space<vmem>>, vector<1x1x64xf32>,
    return
  }
  func.func @transform_0(%arg0: i32) -> (i32, i32, i32) {
    %c0_i32 = arith.constant 0 : i32
    %c0_i32_0 = arith.constant 0 : i32
    %c0_i32_1 = arith.constant 0 : i32
    return %arg0, %c0_i32, %c0_i32_0 : i32, i32, i32
  }
  func.func @transform_1(%arg0: i32) -> (i32, i32) {
    %c0_i32 = arith.constant 0 : i32
    %c0_i32_0 = arith.constant 0 : i32
    %c0_i32_1 = arith.constant 0 : i32
    return %c0_i32, %c0_i32_0 : i32, i32
  }
  func.func @transform_2(%arg0: i32) -> (i32, i32) {
    %c0_i32 = arith.constant 0 : i32
    %c0_i32_0 = arith.constant 0 : i32
    %c0_i32_1 = arith.constant 0 : i32
    return %c0_i32, %c0_i32_0 : i32, i32
  }
  func.func @transform_3(%arg0: i32) -> (i32, i32) {
    %c0_i32 = arith.constant 0 : i32
    %c0_i32_0 = arith.constant 0 : i32
    %c0_i32_1 = arith.constant 0 : i32
    return %c0_i32, %c0_i32_0 : i32, i32
  }
  func.func @transform_4(%arg0: i32) -> (i32, i32) {
    %c0_i32 = arith.constant 0 : i32
    %c0_i32_0 = arith.constant 0 : i32
    %c0_i32_1 = arith.constant 0 : i32
    return %c0_i32, %c0_i32_0 : i32, i32
  }
  func.func @transform_5(%arg0: i32) -> (i32, i32, i32) {
    %c0_i32 = arith.constant 0 : i32
    %c0_i32_0 = arith.constant 0 : i32
    %c0_i32_1 = arith.constant 0 : i32
    return %arg0, %c0_i32, %c0_i32_0 : i32, i32, i32
  }
}

</mosaic_0001>

<bundles_post_ra>
// kernel: tpu_custom_call.1
= control target key start
LH: loop header
LB: loop body
LE: loop exit
PB: predicated region body
PF: predicated region fallthrough
CT: control target
= control target key end

     0   :  { %10 = vsyncpa [#allocation3], 0  ;;  %s1096_s0 = inlined_call_operand.vmem [shape: f32[2,256,64], index: 0, kind: input, shape index: {}]   ;;  %s1097_s1 = inlined_call_operand.vmem [shape: f32[64,16], index: 1, kind: input, shape index: {}]   ;;  %s1098_s2 = inlined_call_operand.vmem [shape: f32[1,16], index: 2, kind: input, shape index: {}]   ;;  %s1099_s3 = inlined_call_operand.vmem [shape: f32[16,64], index: 3, kind: input, shape index: {}]   ;;  %s1100_s4 = inlined_call_operand.vmem [shape: f32[1,64], index: 4, kind: input, shape index: {}]   ;;  %s1101_s5 = inlined_call_operand.hbm [shape: f32[2,1,64], index: 5, kind: output, shape index: {}]  }
   0x1   :  { %12 = vsyncpa [#allocation3 + $0x1], 0  ;;  %s861_s18 = smov 0   ;;  %s863_s19 = smov 0  }
   0x2   :  { %s865_s20 = smov 0   ;;  %s867_s21 = smov 0  }
   0x3 LB: > { %s882_s22 = sadd.s32 4294967295, %s825_s21   ;;  %s649_s23 = sadd.s32 4294967294, %s825_s21   ;;  %s825_s21 = sphi %s867_s21, %s1107_s21   ;;  %s821_s20 = sphi %s865_s20, %s1106_s20   ;;  %s817_s19 = sphi %s863_s19, %s1105_s19   ;;  %s813_s18 = sphi %s861_s18, %s1104_s18  }
   0x4   : > { %s886_s24 = sadd.s32 1, %s825_s21   ;;  %s135_s25 = sadd.s32 1, %s821_s20 }
   0x5   : > { %s132_s26 = ssub.s32 %s825_s21, %s886_s24  ;;  %p145_p0 = scmp.ne.s32.totalorder %s821_s20, %s817_s19 }
   0x6   : > { %p133_p1 = scmp.eq.s32.totalorder %s132_s26, 0  ;;  %p146_p2 = scmp.eq.s32.totalorder %s882_s22, 1 }
   0x7   : > { %p151_p3 = scmp.ne.s32.totalorder %s817_s19, %s813_s18  ;;  %p152_p4 = scmp.eq.s32.totalorder %s649_s23, 1 }
   0x8   : > { %s897_s27 = scalar_select %p133_p1, %s821_s20, %s135_s25  }
   0x9   : > { %p899_p5 = por %p146_p2, %p145_p0  ;;  %p903_p6 = por %p152_p4, %p151_p3 }
   0xa   : > { %p652_p7 = scmp.ge.s32.totalorder %s825_s21, 1  ;;  %p190_p8 = scmp.lt.s32.totalorder %s825_s21, 3 }
   0xc   : > { %p191_p9 = pnand %p652_p7, %p190_p8 }
   0xd   : > { %v397_v0 = vld [vmem:[%s1097_s1] sm:$0xff] (!%p191_p9)  ;;  %v398_v1 = vld [vmem:[%s1097_s1 + $0x8] sm:$0xff] (!%p191_p9)  ;;  %v399_v2 = vld [vmem:[%s1097_s1 + $0x10] sm:$0xff] (!%p191_p9)  ;;  %v827_v3 = vmov (!%p191_p9), 0.0|0.0   ;;  %vm828_vm0 = vmmov (!%p191_p9), 0   ;;  %v829_v6 = vmov (!%p191_p9), 0.0  }
   0xe   : > { %194 = sbr.rel (%p191_p9) target bundleno = 578 (0x242), region = 40  ;;  %702 = vmatprep.subr.bf16.mxu0 (!%p191_p9), %v827_v3  ;;  %v703_v4 = vpack.c.bf16 (!%p191_p9), %v398_v1, %v397_v0  ;;  %v400_v5 = vld [vmem:[%s1097_s1 + $0x18] sm:$0xff] (!%p191_p9)  ;;  %692 = vmatprep.mubr.msk.f32.mxu0 (!%p191_p9), %vm828_vm0, %v829_v6  ;;  %p217_p10 = scmp.lt.s32.totalorder (!%p191_p9), %s882_s22, 1  ;;  %v401_v8 = vld [vmem:[%s1097_s1 + $0x20] sm:$0xff] (!%p191_p9)  ;;  %v402_v9 = vld [vmem:[%s1097_s1 + $0x28] sm:$0xff] (!%p191_p9)  ;;  %vm254_vm1 = vcmask (!%p191_p9), 523264  }
   0xf   : > { %714 = vmatprep.subr.bf16.mxu1 (!%p191_p9), %v827_v3  ;;  %699 = vmatprep.mubr.msk.f32.mxu1 (!%p191_p9), %vm828_vm0, %v829_v6  ;;  %v706_v7 = vpack.c.bf16 (!%p191_p9), %v400_v5, %v399_v2  ;;  %v709_v10 = vpack.c.bf16 (!%p191_p9), %v402_v9, %v401_v8  ;;  %v403_v14 = vld [vmem:[%s1097_s1 + $0x30] sm:$0xff] (!%p191_p9)  ;;  %v404_v15 = vld [vmem:[%s1097_s1 + $0x38] sm:$0xff] (!%p191_p9)  ;;  %vm395_vm2 = vcmask (!%p191_p9), 1040384   ;;  %vm495_vm3 = vcmask (!%p191_p9), 130048   ;;  %s660_s25 = sshll.u32 (!%p191_p9), %s882_s22, 4 }
  0x10   : > { %704 = vmatpush3.bf16.msra.mxu0 (!%p191_p9), %v703_v4  ;;  %v712_v23 = vpack.c.bf16 (!%p191_p9), %v404_v15, %v403_v14  ;;  %vm579_vm4 = vcmask (!%p191_p9), 516096   ;;  %s1054_s8 = scalar_lea.hbm (!%p191_p9), %s1101_s5, %s660_s25 }
  0x11   : > { %705 = vmatprep.subr.bf16.mxu0 (!%p191_p9), %v827_v3 }
  0x14   : > { %707 = vmatpush3.bf16.msra.mxu0 (!%p191_p9), %v706_v7 }
  0x15   : > { %s218_s13 = scalar_select %p217_p10, %s882_s22, 1  ;;  %708 = vmatprep.subr.bf16.mxu0 %v827_v3 }
  0x16   : > { %s830_s22 = smov [#allocation2]  }
  0x17   : > { %s663_s23 = sshll.u32 %s218_s13, 8  ;;  %s767_s11 = sshll.u32 %s830_s22, 4  ;;  %s768_s11 = int_to_ptr.vmem [resolvable:$false] %s767_s11 }
  0x18   : > { %s932_s30 = scalar_lea.vmem %s1096_s0, %s663_s23  ;;  %710 = vmatpush3.bf16.msra.mxu0 %v709_v10  ;;  %s215_s23 = sand.u32 1, %s817_s19  }
  0x19   : > { %v222_v11 = vld [vmem:[%s932_s30] sm:$0xff]  ;;  %v223_v12 = vld [vmem:[%s932_s30 + $0x8] sm:$0xff]  ;;  %v224_v13 = vld [vmem:[%s932_s30 + $0x10] sm:$0xff]  ;;  %711 = vmatprep.subr.bf16.mxu0 %v827_v3  ;;  %s216_s26 = scalar_lea.vmem [#allocation2], %s215_s23  ;;  %s582_s9 = scalar_lea.sflag [#allocation3], %s215_s23 }
  0x1a   : > { %v225_v16 = vld [vmem:[%s932_s30 + $0x18] sm:$0xff]  ;;  %v255_v17 = vsel %vm254_vm1, %v222_v11, 0.0  ;;  %v256_v18 = vsel %vm254_vm1, %v223_v12, 0.0  ;;  %v258_v19 = vsel %vm254_vm1, %v224_v13, 0.0  ;;  %v226_v20 = vld [vmem:[%s932_s30 + $0x20] sm:$0xff]  ;;  %v227_v24 = vld [vmem:[%s932_s30 + $0x28] sm:$0xff] }
  0x1b   : > { %v257_v21 = vadd.f32 %v256_v18, %v255_v17  ;;  %v260_v22 = vsel %vm254_vm1, %v225_v16, 0.0  ;;  %v262_v26 = vsel %vm254_vm1, %v226_v20, 0.0  ;;  %v228_v27 = vld [vmem:[%s932_s30 + $0x30] sm:$0xff]  ;;  %v264_v29 = vsel %vm254_vm1, %v227_v24, 0.0  ;;  %v229_v30 = vld [vmem:[%s932_s30 + $0x38] sm:$0xff]  ;;  %v230_v32 = vld [vmem:[%s932_s30 + $0x40] sm:$0xff] }
  0x1c   : > { %713 = vmatpush3.bf16.msra.mxu0 %v712_v23  ;;  %v266_v33 = vsel %vm254_vm1, %v228_v27, 0.0  ;;  %v268_v35 = vsel %vm254_vm1, %v229_v30, 0.0  ;;  %v231_v36 = vld [vmem:[%s932_s30 + $0x48] sm:$0xff]  ;;  %v270_v38 = vsel %vm254_vm1, %v230_v32, 0.0  ;;  %v326_v39 = vsel %vm254_vm1, %v222_v11, -inf  ;;  %v232_v40 = vld [vmem:[%s932_s30 + $0x50] sm:$0xff] }
  0x1d   : > { %v259_v25 = vadd.f32 %v258_v19, %v257_v21  ;;  %v327_v41 = vsel %vm254_vm1, %v223_v12, -inf  ;;  %v328_v42 = vsel %vm254_vm1, %v224_v13, -inf  ;;  %v329_v43 = vsel %vm254_vm1, %v225_v16, -inf  ;;  %v233_v50 = vld [vmem:[%s932_s30 + $0x58] sm:$0xff]  ;;  %v234_v54 = vld [vmem:[%s932_s30 + $0x60] sm:$0xff]  ;;  %v235_v0 = vld [vmem:[%s932_s30 + $0x68] sm:$0xff] }
  0x1e   : > { %v330_v44 = vsel %vm254_vm1, %v226_v20, -inf  ;;  %v332_v46 = vsel %vm254_vm1, %v227_v24, -inf  ;;  %v334_v47 = vsel %vm254_vm1, %v228_v27, -inf  ;;  %v336_v48 = vsel %vm254_vm1, %v229_v30, -inf  ;;  %v236_v3 = vld [vmem:[%s932_s30 + $0x70] sm:$0xff]  ;;  %v237_v8 = vld [vmem:[%s932_s30 + $0x78] sm:$0xff] }
  0x1f   : > { %v261_v28 = vadd.f32 %v260_v22, %v259_v25  ;;  %v272_v49 = vsel %vm254_vm1, %v231_v36, 0.0  ;;  %v274_v52 = vsel %vm254_vm1, %v232_v40, 0.0  ;;  %v331_v53 = vmax.f32 %v326_v39, %v330_v44  ;;  %v238_v15 = vld [vmem:[%s932_s30 + $0x80] sm:$0xff]  ;;  %v239_v18 = vld [vmem:[%s932_s30 + $0x88] sm:$0xff]  ;;  %v240_v19 = vld [vmem:[%s932_s30 + $0x90] sm:$0xff]  ;;  %s769_s12 = scalar_lea.vmem %s768_s11, 32 }
  0x20   : > { %v333_v55 = vmax.f32 %v327_v41, %v332_v46  ;;  %v335_v56 = vmax.f32 %v328_v42, %v334_v47  ;;  %v337_v57 = vmax.f32 %v329_v43, %v336_v48  ;;  %v338_v58 = vsel %vm254_vm1, %v230_v32, -inf  ;;  %v241_v24 = vld [vmem:[%s932_s30 + $0x98] sm:$0xff]  ;;  %v242_v32 = vld [vmem:[%s932_s30 + $0xa0] sm:$0xff] }
  0x21   : > { %v263_v31 = vadd.f32 %v262_v26, %v261_v28  ;;  %v340_v60 = vsel %vm254_vm1, %v231_v36, -inf  ;;  %v342_v61 = vsel %vm254_vm1, %v232_v40, -inf  ;;  %v344_v62 = vsel %vm254_vm1, %v233_v50, -inf  ;;  %v245_v39 = vld [vmem:[%s932_s30 + $0xb8] sm:$0xff]  ;;  %v246_v47 = vld [vmem:[%s932_s30 + $0xc0] sm:$0xff] }
  0x22   : > { %v276_v63 = vsel %vm254_vm1, %v233_v50, 0.0  ;;  %v278_v2 = vsel %vm254_vm1, %v234_v54, 0.0  ;;  %v339_v4 = vmax.f32 %v331_v53, %v338_v58  ;;  %v341_v5 = vmax.f32 %v333_v55, %v340_v60  ;;  %v249_v55 = vld [vmem:[%s932_s30 + $0xd8] sm:$0xff] }
  0x23   : > { %v265_v34 = vadd.f32 %v264_v29, %v263_v31  ;;  %v343_v6 = vmax.f32 %v335_v56, %v342_v61  ;;  %v345_v7 = vmax.f32 %v337_v57, %v344_v62  ;;  %v346_v10 = vsel %vm254_vm1, %v234_v54, -inf  ;;  %v248_v54 = vld [vmem:[%s932_s30 + $0xd0] sm:$0xff] }
  0x24   : > { %v348_v11 = vsel %vm254_vm1, %v235_v0, -inf  ;;  %v350_v12 = vsel %vm254_vm1, %v236_v3, -inf  ;;  %v280_v13 = vsel %vm254_vm1, %v235_v0, 0.0  ;;  %v352_v14 = vsel %vm254_vm1, %v237_v8, -inf  ;;  %v253_v0 = vld [vmem:[%s932_s30 + $0xf8] sm:$0xff] }
  0x25   : > { %v267_v37 = vadd.f32 %v266_v33, %v265_v34  ;;  %v282_v17 = vsel %vm254_vm1, %v236_v3, 0.0  ;;  %v347_v20 = vmax.f32 %v339_v4, %v346_v10  ;;  %v349_v21 = vmax.f32 %v341_v5, %v348_v11  ;;  %v243_v33 = vld [vmem:[%s932_s30 + $0xa8] sm:$0xff] }
  0x26   : > { %v351_v22 = vmax.f32 %v343_v6, %v350_v12  ;;  %v354_v23 = vsel %vm254_vm1, %v238_v15, -inf  ;;  %v353_v26 = vmax.f32 %v345_v7, %v352_v14  ;;  %v356_v27 = vsel %vm254_vm1, %v239_v18, -inf  ;;  %v251_v6 = vld [vmem:[%s932_s30 + $0xe8] sm:$0xff] }
  0x27   : > { %v269_v45 = vadd.f32 %v268_v35, %v267_v37  ;;  %v358_v28 = vsel %vm254_vm1, %v240_v19, -inf  ;;  %v284_v29 = vsel %vm254_vm1, %v237_v8, 0.0  ;;  %v360_v30 = vsel %vm254_vm1, %v241_v24, -inf }
  0x28   : > { %v286_v34 = vsel %vm254_vm1, %v238_v15, 0.0  ;;  %v355_v35 = vmax.f32 %v347_v20, %v354_v23  ;;  %v357_v36 = vmax.f32 %v349_v21, %v356_v27  ;;  %v359_v37 = vmax.f32 %v351_v22, %v358_v28 }
  0x29   : > { %v271_v51 = vadd.f32 %v270_v38, %v269_v45  ;;  %v244_v38 = vld [vmem:[%s932_s30 + $0xb0] sm:$0xff]  ;;  %v361_v41 = vmax.f32 %v353_v26, %v360_v30  ;;  %v362_v42 = vsel %vm254_vm1, %v242_v32, -inf  ;;  %v364_v43 = vsel %vm254_vm1, %v243_v33, -inf }
  0x2a   : > { %v288_v44 = vsel %vm254_vm1, %v239_v18, 0.0  ;;  %v366_v45 = vsel %vm254_vm1, %v244_v38, -inf  ;;  %v368_v46 = vsel %vm254_vm1, %v245_v39, -inf  ;;  %v290_v50 = vsel %vm254_vm1, %v240_v19, 0.0 }
  0x2b   : > { %v273_v59 = vadd.f32 %v272_v49, %v271_v51  ;;  %v247_v49 = vld [vmem:[%s932_s30 + $0xc8] sm:$0xff]  ;;  %v363_v51 = vmax.f32 %v355_v35, %v362_v42  ;;  %v370_v53 = vsel %vm254_vm1, %v246_v47, -inf  ;;  %v367_v57 = vmax.f32 %v359_v37, %v366_v45 }
  0x2c   : > { %v369_v58 = vmax.f32 %v361_v41, %v368_v46  ;;  %v292_v60 = vsel %vm254_vm1, %v241_v24, 0.0  ;;  %v374_v61 = vsel %vm254_vm1, %v248_v54, -inf  ;;  %v376_v62 = vsel %vm254_vm1, %v249_v55, -inf }
  0x2d   : > { %v275_v1 = vadd.f32 %v274_v52, %v273_v59  ;;  %v365_v52 = vmax.f32 %v357_v36, %v364_v43  ;;  %v372_v59 = vsel %vm254_vm1, %v247_v49, -inf  ;;  %v294_v3 = vsel %vm254_vm1, %v242_v32, 0.0 }
  0x2e   : > { %v371_v4 = vmax.f32 %v363_v51, %v370_v53  ;;  %v375_v8 = vmax.f32 %v367_v57, %v374_v61  ;;  %v296_v11 = vsel %vm254_vm1, %v243_v33, 0.0  ;;  %v380_v12 = vsel %vm254_vm1, %v251_v6, -inf  ;;  %v655_v61 = vld [vmem:[%s1098_s2] ss:$0 sm:$0xff] }
  0x2f   : > { %v277_v9 = vadd.f32 %v276_v63, %v275_v1  ;;  %v252_v63 = vld [vmem:[%s932_s30 + $0xf0] sm:$0xff]  ;;  %v373_v5 = vmax.f32 %v365_v52, %v372_v59  ;;  %v384_v14 = vsel %vm254_vm1, %v253_v0, -inf  ;;  %v300_v22 = vsel %vm254_vm1, %v245_v39, 0.0  ;;  %v487_v59 = vld [vmem:[%s1099_s3 + $0x8] sm:$0xff] }
  0x30   : > { %v302_v24 = vsel %vm254_vm1, %v246_v47, 0.0  ;;  %v304_v28 = vsel %vm254_vm1, %v247_v49, 0.0  ;;  %v306_v30 = vsel %vm254_vm1, %v248_v54, 0.0  ;;  %v308_v33 = vsel %vm254_vm1, %v249_v55, 0.0 }
  0x31   : > { %v279_v16 = vadd.f32 %v278_v2, %v277_v9  ;;  %v250_v2 = vld [vmem:[%s932_s30 + $0xe0] sm:$0xff]  ;;  %v377_v9 = vmax.f32 %v369_v58, %v376_v62  ;;  %v381_v19 = vmax.f32 %v373_v5, %v380_v12  ;;  %v316_v43 = vsel %vm254_vm1, %v253_v0, 0.0  ;;  %s594_s30 = sshll.u32 %s216_s26, 4  ;;  %s1056_s30 = int_to_ptr.vmem [resolvable:$true] %s594_s30 }
  0x32   : > { %v378_v10 = vsel %vm254_vm1, %v250_v2, -inf  ;;  %v310_v35 = vsel %vm254_vm1, %v250_v2, 0.0  ;;  %v486_v58 = vld [vmem:[%s1099_s3] sm:$0xff]  ;;  %s763_s10 = scalar_lea.vmem %s1056_s30, 16  ;;  %p770_p0 = scmp.lt.s32.totalorder %s1056_s30, %s768_s11 }
  0x33   : > { %v281_v25 = vadd.f32 %v280_v13, %v279_v16  ;;  %v382_v13 = vsel %vm254_vm1, %v252_v63, -inf  ;;  %v298_v16 = vsel %vm254_vm1, %v244_v38, 0.0  ;;  %v385_v21 = vmax.f32 %v377_v9, %v384_v14  ;;  %v657_v2 = vld [vmem:[%s1100_s4] ss:$0 sm:$0xff]  ;;  %p764_p11 = scmp.ne.s32.totalorder %s1056_s30, %s763_s10  ;;  %p771_p1 = scmp.lt.s32.totalorder %s769_s12, %s763_s10 }
  0x34   : > { %v383_v20 = vmax.f32 %v375_v8, %v382_v13  ;;  %v312_v38 = vsel %vm254_vm1, %v251_v6, 0.0 }
  0x35   : > { %v283_v31 = vadd.f32 %v282_v17, %v281_v25  ;;  %v379_v17 = vmax.f32 %v371_v4, %v378_v10  ;;  %p765_p12 = pnand %p764_p11, %p899_p5  ;;  %p772_p2 = por %p771_p1, %p770_p0 }
  0x36   : > { %v387_v27 = vmax.f32 %v383_v20, %v385_v21 }
  0x37   : > { %v285_v40 = vadd.f32 %v284_v29, %v283_v31  ;;  %v386_v26 = vmax.f32 %v379_v17, %v381_v19  ;;  %p766_p13 = pneg %p765_p12 }
  0x39   : > { %v287_v48 = vadd.f32 %v286_v34, %v285_v40  ;;  %v388_v32 = vmax.f32 %v386_v26, %v387_v27  ;;  %v314_v40 = vsel %vm254_vm1, %v252_v63, 0.0  ;;  %p773_p3 = pnand %p772_p2, %p766_p13 }
  0x3b   : > { %v289_v56 = vadd.f32 %v288_v44, %v287_v48  ;;  %v389_v37 = vrot.slane %v388_v32, 4 }
  0x3d   : > { %v291_v1 = vadd.f32 %v290_v50, %v289_v56  ;;  %v390_v42 = vmax.f32 %v388_v32, %v389_v37 }
  0x3f   : > { %v293_v7 = vadd.f32 %v292_v60, %v291_v1  ;;  %v391_v46 = vrot.slane %v390_v42, 2  ;;  %v715_v60 = vpack.c.bf16 %v487_v59, %v486_v58 }
  0x41   : > { %v295_v15 = vadd.f32 %v294_v3, %v293_v7  ;;  %v392_v49 = vmax.f32 %v390_v42, %v391_v46  ;;  %716 = vmatpush3.bf16.msra.mxu1 %v715_v60 }
  0x43   : > { %v297_v18 = vadd.f32 %v296_v11, %v295_v15  ;;  %v393_v52 = vrot.slane %v392_v49, 1 }
  0x45   : > { %v299_v23 = vadd.f32 %v298_v16, %v297_v18  ;;  %v394_v55 = vmax.f32 %v392_v49, %v393_v52 }
  0x47   : > { %v301_v25 = vadd.f32 %v300_v22, %v299_v23 }
  0x49   : > { %v303_v29 = vadd.f32 %v302_v24, %v301_v25 }
  0x4b   : > { %v305_v31 = vadd.f32 %v304_v28, %v303_v29 }
  0x4d   : > { %v307_v34 = vadd.f32 %v306_v30, %v305_v31 }
  0x4f   : > { %v309_v36 = vadd.f32 %v308_v33, %v307_v34 }
  0x51   : > { %v311_v39 = vadd.f32 %v310_v35, %v309_v36 }
  0x53   : > { %v313_v41 = vadd.f32 %v312_v38, %v311_v39 }
  0x55   : > { %v315_v44 = vadd.f32 %v314_v40, %v313_v41 }
  0x57   : > { %v317_v45 = vadd.f32 %v316_v43, %v315_v44 }
  0x59   : > { %v318_v47 = vrot.slane %v317_v45, 4 }
  0x5b   : > { %v319_v48 = vadd.f32 %v318_v47, %v317_v45 }
  0x5d   : > { %v320_v50 = vrot.slane %v319_v48, 2 }
  0x5f   : > { %v321_v51 = vadd.f32 %v320_v50, %v319_v48 }
  0x61   : > { %v322_v53 = vrot.slane %v321_v51, 1 }
  0x63   : > { %v323_v54 = vadd.f32 %v322_v53, %v321_v51 }
  0x65   : > { %v325_v56 = vmul.f32 0.00390625, %v323_v54 }
  0x67   : > { %v396_v57 = vsel %vm395_vm2, %v325_v56, %v394_v55 }
  0x68   : > { %693 = vmatmul.mubr.msk.f32.vlgmr.msra.gmra.mrb[0].mxu0 %vm254_vm1, %v396_v57 }
 0x13b   : > { %v481_v62 = vpop.f32.mrb[0].mxu0 }
 0x13c   : > { %v482_v63 = vadd.f32 %v655_v61, %v481_v62  ;;  %v694_v0 = vpop.f32.mrb[1].mxu0 }
 0x13e   : > { %v485_v1 = vmax.f32 %v482_v63, 0.0 }
 0x140   : > { %700 = vmatmul.mubr.msk.f32.vlgmr.msra.gmra.mrb[0].mxu1 %vm495_vm3, %v485_v1 }
 0x213   : > { %v565_v3 = vpop.f32.mrb[0].mxu1 }
 0x214   : > { %v566_v4 = vadd.f32 %v657_v2, %v565_v3  ;;  %v701_v5 = vpop.f32.mrb[1].mxu1 }
 0x216   : > { %v570_v6 = vrot.slane %v566_v4, 1 }
 0x218   : > { %v572_v7 = vadd.f32 %v570_v6, %v566_v4 }
 0x21a   : > { %v659_v8 = vmul.f32 -1.442695, %v572_v7 }
 0x21c   : > { %759 = vpow2.f32 %v659_v8 }
 0x226   : > { %v760_v9 = vpop.eup %759 }
 0x227   : > { %v576_v10 = vadd.f32 1.0, %v760_v9 }
 0x229   : > { %761 = vrcp.f32 %v576_v10 }
 0x233   : > { %v762_v11 = vpop.eup %761 }
 0x234   : > { %580 = vst.msk [vmem:[%s216_s26] sm:$0x1] %vm579_vm4, %v762_v11 }
 0x235   : > { %776 = shalt.err (!%p773_p3)
}
 0x236   : > { %s777_s13 = scalar_lea.hbm %s1054_s8, 16  ;;  %s781_s16 = scalar_lea.hbm %s1101_s5, 32 }
 0x237   : > { %p778_p4 = scmp.ne.s32.totalorder %s1054_s8, %s777_s13  ;;  %p782_p9 = scmp.lt.u32.totalorder %s1054_s8, %s1101_s5 }
 0x238   : > { %p783_p10 = scmp.lt.u32.totalorder %s781_s16, %s777_s13  ;;  %p785_p12 = scmp.lt.u32.totalorder %s777_s13, %s1054_s8 }
 0x239   : > { %p779_p7 = pnand %p778_p4, %p899_p5 }
 0x23a   : > { %p784_p11 = por %p783_p10, %p782_p9 }
 0x23b   : > { %p780_p8 = pneg %p779_p7 }
 0x23c   : > { %p786_p13 = por %p785_p12, %p784_p11 }
 0x23e   : > { %p787_p0 = pnand %p786_p13, %p780_p8 }
 0x240   : > { %790 = shalt.err (!%p787_p0)
}
 0x241   : > { %717 = dma.vmem_to_hbm [thread:$0]  (%p899_p5), %s1056_s30, 16, %s1054_s8, %s582_s9  }
 0x242 PF: > { %p723_p1 = scmp.ge.s32.totalorder %s825_s21, 2  ;;  %s606_s25 = sand.u32 1, %s813_s18  }
 0x243   : > { %s607_s26 = scalar_lea.sflag [#allocation3], %s606_s25 }
 0x244   : > { %p720_p2 = pnand %p723_p1, %p903_p6 }
 0x246   : > { %808 = dma.done.wait (!%p720_p2), %s607_s26, 16  }
 0x247   : > { %810 = vsyncadd (!%p720_p2), %s607_s26, 4294967280  ;;  %p15_p3 = scmp.ge.s32.totalorder %s886_s24, 4   ;;  %s1104_s18 = smov %s817_s19 }
 0x248   : > { %s1105_s19 = smov %s821_s20  ;;  %s1106_s20 = smov %s897_s27 }
 0x249   : > { %s1107_s21 = smov %s886_s24  ;;  %17 = sbr.rel (!%p15_p3) target bundleno = 3 (0x3), region = 75 }
 0x250   :  { %611 = vsyncpa [#allocation3], 1 }
 0x251   :  { %613 = vsyncpa [#allocation3 + $0x1], 1 }

</bundles_post_ra>
